<compile_context>
chip_gen: v7x
topology: tpu7x:2x2x1
jax: 0.10.0
libtpu: 0.0.40
codegen_flags: <defaults>
</compile_context>

<pallas_src>
import functools

import jax
import jax.numpy as jnp
from jax import lax
from jax.experimental import pallas as pl
from jax.experimental.pallas import tpu as pltpu


def _round_up(x, m):
    return (x + m - 1) // m * m


# ----------------------------------------------------------------------------
# Fused Pallas kernel: backbone matmul (tiled over K) + reduce_sim + classifier
# ----------------------------------------------------------------------------
def _fused_l2p_kernel(x_ref, wb_ref, bb_ref, kn_ref, wc_ref, bc_ref,
                      logits_ref, sim_ref, acc_ref, *, n_k):
    # All grid queries stay at the kernel top level (never inside pl.when bodies).
    k = pl.program_id(1)

    @pl.when(k == 0)
    def _init():
        acc_ref[...] = jnp.zeros_like(acc_ref)

    # feat accumulation: acc += x[:, k_tile] @ W_b[k_tile, :]  (bf16 ops, f32 acc)
    acc_ref[...] += jnp.dot(x_ref[...], wb_ref[...],
                            preferred_element_type=jnp.float32)

    @pl.when(k == n_k - 1)
    def _epilogue():
        feat = acc_ref[...] + bb_ref[...]                      # [tm, E_pad] f32
        # ---- classifier: logits = feat @ W_c + b_c ----------------------------
        logits_ref[...] = (
            jnp.dot(feat.astype(wc_ref.dtype), wc_ref[...],
                    preferred_element_type=jnp.float32)
            + bc_ref[...]
        )
        # ---- L2P reduce_sim: per-row summed cosine sim vs pre-normalized keys -
        q = feat * lax.rsqrt(jnp.sum(feat * feat, axis=-1, keepdims=True) + 1e-12)
        # contract feature axis of both operands (no explicit transpose)
        sim = lax.dot_general(
            q, kn_ref[...],
            dimension_numbers=(((1,), (1,)), ((), ())),
            preferred_element_type=jnp.float32)                # [tm, P_pad]
        row_sim = jnp.sum(sim, axis=-1, keepdims=True)         # [tm, 1]
        sim_ref[...] = jnp.broadcast_to(row_sim, sim_ref.shape)  # lane-dense [tm, 128]


# ----------------------------------------------------------------------------
# Wrapper: padding to lane-dense shapes, single fused pallas_call
# ----------------------------------------------------------------------------
def model_forward(x_nchw, params, train=True):
    """Mirrors Model.forward: feat, reduce_sim = backbone(x); return classifier(feat), reduce_sim."""
    B = x_nchw.shape[0]
    x_flat = x_nchw.reshape(B, -1).astype(jnp.float32)          # glue: flatten NCHW
    D = x_flat.shape[1]
    E = params["w_b"].shape[1]
    N = params["w_c"].shape[1]
    P = params["keys"].shape[0]

    # Pre-normalize prompt keys once (input independent) — hoisted out of the kernel.
    keys = params["keys"].astype(jnp.float32)
    kn = keys * lax.rsqrt(jnp.sum(keys * keys, axis=-1, keepdims=True) + 1e-12)

    # ---- padded / tiled shapes (lane dims -> x128, sublane dims -> x8/x16) ----
    TK = 512                                   # K tile (multiple of 128, VMEM-safe)
    B_pad = _round_up(B, 16)                   # bf16 sublane packing friendly
    tm = B_pad if B_pad <= 256 else 256        # M tile
    B_grid = _round_up(B_pad, tm)
    D_pad = _round_up(D, TK)
    E_pad = _round_up(E, 128)
    N_pad = _round_up(N, 128)
    P_pad = _round_up(P, 8)

    compute_dtype = jnp.bfloat16               # MXU operands; accumulation stays f32

    def pad2(a, rows, cols):
        return jnp.pad(a, ((0, rows - a.shape[0]), (0, cols - a.shape[1])))

    x_p = pad2(x_flat, B_grid, D_pad).astype(compute_dtype)
    wb_p = pad2(params["w_b"].astype(jnp.float32), D_pad, E_pad).astype(compute_dtype)
    bb_p = pad2(params["b_b"].astype(jnp.float32), 1, E_pad)
    kn_p = pad2(kn, P_pad, E_pad)                               # zero rows -> zero sim
    wc_p = pad2(params["w_c"].astype(jnp.float32), E_pad, N_pad).astype(compute_dtype)
    bc_p = pad2(params["b_c"].astype(jnp.float32), 1, N_pad)

    n_m = B_grid // tm
    n_k = D_pad // TK

    kernel = functools.partial(_fused_l2p_kernel, n_k=n_k)

    flops = (2 * B_grid * D_pad * E_pad          # backbone projection
             + 2 * B_grid * E_pad * N_pad        # classifier
             + 2 * B_grid * E_pad * P_pad)       # key similarity
    bytes_accessed = (
        (x_p.size + wb_p.size + wc_p.size) * 2                  # bf16 operands
        + (kn_p.size + bb_p.size + bc_p.size) * 4               # f32 small inputs
        + (B_grid * N_pad + B_grid * 128) * 4                   # f32 outputs
    )

    logits_p, sim_p = pl.pallas_call(
        kernel,
        out_shape=(
            jax.ShapeDtypeStruct((B_grid, N_pad), jnp.float32),  # padded logits
            jax.ShapeDtypeStruct((B_grid, 128), jnp.float32),    # per-row sim (lane-dense)
        ),
        grid_spec=pltpu.PrefetchScalarGridSpec(
            num_scalar_prefetch=0,
            grid=(n_m, n_k),                                     # reduction axis last
            in_specs=[
                pl.BlockSpec((tm, TK), lambda m, k: (m, k)),         # x tile
                pl.BlockSpec((TK, E_pad), lambda m, k: (k, 0)),      # W_b tile
                pl.BlockSpec((1, E_pad), lambda m, k: (0, 0)),       # b_b
                pl.BlockSpec((P_pad, E_pad), lambda m, k: (0, 0)),   # normalized keys
                pl.BlockSpec((E_pad, N_pad), lambda m, k: (0, 0)),   # W_c
                pl.BlockSpec((1, N_pad), lambda m, k: (0, 0)),       # b_c
            ],
            out_specs=(
                pl.BlockSpec((tm, N_pad), lambda m, k: (m, 0)),      # logits
                pl.BlockSpec((tm, 128), lambda m, k: (m, 0)),        # per-row sim
            ),
            scratch_shapes=[pltpu.VMEM((tm, E_pad), jnp.float32)],   # feat accumulator
        ),
        compiler_params=pltpu.CompilerParams(
            dimension_semantics=("parallel", "arbitrary"),
            vmem_limit_bytes=48 * 1024 * 1024,
        ),
        cost_estimate=pl.CostEstimate(
            flops=flops, transcendentals=B_grid, bytes_accessed=bytes_accessed),
    )(x_p, wb_p, bb_p, kn_p, wc_p, bc_p)

    logits = logits_p[:B, :N]
    # Padded batch rows are sliced away here; divide by the TRUE batch size.
    reduce_sim = jnp.sum(sim_p[:B, 0]) / jnp.float32(B)
    return logits, reduce_sim


# ----------------------------------------------------------------------------
# Deterministic parameter init + smoke test
# ----------------------------------------------------------------------------
def init_params(key, in_dim, embed_dim, total_cls_num, pool_size):
    k1, k2, k3, k4, k5 = jax.random.split(key, 5)
    return {
        # synthetic backbone
        "w_b": (jax.random.normal(k1, (in_dim, embed_dim), jnp.float32)
                / jnp.sqrt(jnp.float32(in_dim))),
        "b_b": jax.random.normal(k2, (1, embed_dim), jnp.float32) * 0.01,
        "keys": jax.random.normal(k3, (pool_size, embed_dim), jnp.float32),
        # classifier nn.Linear(embed_dim, total_cls_num, bias=True)
        "w_c": (jax.random.normal(k4, (embed_dim, total_cls_num), jnp.float32)
                / jnp.sqrt(jnp.float32(embed_dim))),
        "b_c": jax.random.normal(k5, (1, total_cls_num), jnp.float32) * 0.01,
    }


if __name__ == "__main__":
    # Small shapes consistent with the forward: NCHW image input, embed_dim, class count.
    B, C, H, W = 2, 4, 16, 16
    embed_dim = 32
    total_cls_num = 10
    pool_size = 8

    key = jax.random.PRNGKey(0)
    kx, kp = jax.random.split(key)
    x = jax.random.normal(kx, (B, C, H, W), jnp.float32)
    params = init_params(kp, C * H * W, embed_dim, total_cls_num, pool_size)

    logits, reduce_sim = jax.jit(model_forward, static_argnames=("train",))(
        x, params, train=True)
    logits = jax.block_until_ready(logits)
    reduce_sim = jax.block_until_ready(reduce_sim)

    assert logits.shape == (B, total_cls_num)
    assert reduce_sim.shape == ()
    assert bool(jnp.all(jnp.isfinite(logits)))
    assert bool(jnp.isfinite(reduce_sim))
    print("KERNEL_OK")
</pallas_src>

<mosaic_0001>
module attributes {stable_mosaic.version = 11 : i64} {
  func.func @_fused_l2p_kernel(%arg0: i32, %arg1: i32, %arg2: memref<16x512xbf16, #tpu.memory_space<vmem>>, %arg3: memref<512x128xbf16, #tpu.memory_space<vmem>>, %arg4: memref<1x128xf32, #tpu.memory_space<vmem>>, %arg5: memref<8x128xf32, #tpu.memory_space<vmem>>, %arg6: memref<128x128xbf16, #tpu.memory_space<vmem>>, %arg7: memref<1x128xf32, #tpu.memory_space<vmem>>, %arg8: memref<16x128xf32, #tpu.memory_space<vmem>>, %arg9: memref<16x128xf32, #tpu.memory_space<vmem>>, %arg10: memref<16x128xf32, #tpu.memory_space<vmem>>) attributes {dimension_semantics = [#tpu.dimension_semantics<parallel>, #tpu.dimension_semantics<arbitrary>], iteration_bounds = array<i64: 1, 2>, scalar_prefetch = 0 : i64, scratch_operands = 1 : i64, tpu.core_type = #tpu.core_type<tc>, window_params = [{transform_indices = @transform_0, window_bounds = array<i64: 16, 512>}, {transform_indices = @transform_1, window_bounds = array<i64: 512, 128>}, {pipeline_mode = #tpu.pipeline_mode<synchronous>, transform_indices = @transform_2, window_bounds = array<i64: 1, 128>}, {pipeline_mode = #tpu.pipeline_mode<synchronous>, transform_indices = @transform_3, window_bounds = array<i64: 8, 128>}, {pipeline_mode = #tpu.pipeline_mode<synchronous>, transform_indices = @transform_4, window_bounds = array<i64: 128, 128>}, {pipeline_mode = #tpu.pipeline_mode<synchronous>, transform_indices = @transform_5, window_bounds = array<i64: 1, 128>}, {transform_indices = @transform_6, window_bounds = array<i64: 16, 128>}, {transform_indices = @transform_7, window_bounds = array<i64: 16, 128>}]} {
    %c0_i32 = arith.constant 0 : i32
    %0 = arith.cmpi eq, %arg1, %c0_i32 : i32
    %1 = arith.extui %0 : i1 to i32
    %c0_i32_0 = arith.constant 0 : i32
    %2 = arith.cmpi ne, %1, %c0_i32_0 : i32
    scf.if %2 {
      %cst_9 = arith.constant 0.000000e+00 : f32
      %12 = vector.broadcast %cst_9 : f32 to vector<16x128xf32>
      %c0_10 = arith.constant 0 : index
      %c0_11 = arith.constant 0 : index
      %13 = vector.load %arg10[%c0_10, %c0_11] : memref<16x128xf32, #tpu.memory_space<vmem>>, vector<16x128xf32>
      tpu.vector_store %arg10[%c0_10, %c0_11], %12 {strides = array<i32>} : memref<16x128xf32, #tpu.memory_space<vmem>>, vector<16x128xf32>,
    } else {
    }
    %c0 = arith.constant 0 : index
    %c0_1 = arith.constant 0 : index
    %3 = vector.load %arg10[%c0, %c0_1] : memref<16x128xf32, #tpu.memory_space<vmem>>, vector<16x128xf32>
    %c0_2 = arith.constant 0 : index
    %c0_3 = arith.constant 0 : index
    %4 = vector.load %arg2[%c0_2, %c0_3] : memref<16x512xbf16, #tpu.memory_space<vmem>>, vector<16x512xbf16>
    %c0_4 = arith.constant 0 : index
    %c0_5 = arith.constant 0 : index
    %5 = vector.load %arg3[%c0_4, %c0_5] : memref<512x128xbf16, #tpu.memory_space<vmem>>, vector<512x128xbf16>
    %cst = arith.constant dense<0.000000e+00> : vector<16x128xf32>
    %6 = tpu.matmul %4, %5, %cst {dimension_numbers = #tpu.dot_dimension_numbers<[1], [0], [0], [1], [0, 0, 1, 1], [], []>} : vector<16x512xbf16>, vector<512x128xbf16>, vector<16x128xf32> -> vector<16x128xf32>
    %7 = arith.addf %3, %6 : vector<16x128xf32>
    %c0_6 = arith.constant 0 : index
    %c0_7 = arith.constant 0 : index
    %8 = vector.load %arg10[%c0_6, %c0_7] : memref<16x128xf32, #tpu.memory_space<vmem>>, vector<16x128xf32>
    tpu.vector_store %arg10[%c0_6, %c0_7], %7 {strides = array<i32>} : memref<16x128xf32, #tpu.memory_space<vmem>>, vector<16x128xf32>,
    %c1_i32 = arith.constant 1 : i32
    %9 = arith.cmpi eq, %arg1, %c1_i32 : i32
    %10 = arith.extui %9 : i1 to i32
    %c0_i32_8 = arith.constant 0 : i32
    %11 = arith.cmpi ne, %10, %c0_i32_8 : i32
    scf.if %11 {
      %c0_9 = arith.constant 0 : index
      %c0_10 = arith.constant 0 : index
      %12 = vector.load %arg10[%c0_9, %c0_10] : memref<16x128xf32, #tpu.memory_space<vmem>>, vector<16x128xf32>
      %c0_11 = arith.constant 0 : index
      %c0_12 = arith.constant 0 : index
      %13 = vector.load %arg4[%c0_11, %c0_12] : memref<1x128xf32, #tpu.memory_space<vmem>>, vector<1x128xf32>
      %14 = vector.broadcast %13 : vector<1x128xf32> to vector<16x128xf32>
      %15 = arith.addf %12, %14 : vector<16x128xf32>
      %16 = arith.truncf %15 : vector<16x128xf32> to vector<16x128xbf16>
      %c0_13 = arith.constant 0 : index
      %c0_14 = arith.constant 0 : index
      %17 = vector.load %arg6[%c0_13, %c0_14] : memref<128x128xbf16, #tpu.memory_space<vmem>>, vector<128x128xbf16>
      %cst_15 = arith.constant dense<0.000000e+00> : vector<16x128xf32>
      %18 = tpu.matmul %16, %17, %cst_15 {dimension_numbers = #tpu.dot_dimension_numbers<[1], [0], [0], [1], [0, 0, 1, 1], [], []>} : vector<16x128xbf16>, vector<128x128xbf16>, vector<16x128xf32> -> vector<16x128xf32>
      %c0_16 = arith.constant 0 : index
      %c0_17 = arith.constant 0 : index
      %19 = vector.load %arg7[%c0_16, %c0_17] : memref<1x128xf32, #tpu.memory_space<vmem>>, vector<1x128xf32>
      %20 = vector.broadcast %19 : vector<1x128xf32> to vector<16x128xf32>
      %21 = arith.addf %18, %20 : vector<16x128xf32>
      %c0_18 = arith.constant 0 : index
      %c0_19 = arith.constant 0 : index
      %22 = vector.load %arg8[%c0_18, %c0_19] : memref<16x128xf32, #tpu.memory_space<vmem>>, vector<16x128xf32>
      tpu.vector_store %arg8[%c0_18, %c0_19], %21 {strides = array<i32>} : memref<16x128xf32, #tpu.memory_space<vmem>>, vector<16x128xf32>,
      %23 = arith.mulf %15, %15 : vector<16x128xf32>
      %cst_20 = arith.constant dense<0.000000e+00> : vector<16xf32>
      %24 = vector.multi_reduction <add>, %23, %cst_20 [1] : vector<16x128xf32> to vector<16xf32>
      %25 = vector.shape_cast %24 : vector<16xf32> to vector<16x1xf32>
      %cst_21 = arith.constant 9.99999996E-13 : f32
      %26 = vector.broadcast %cst_21 : f32 to vector<16x1xf32>
      %27 = arith.addf %25, %26 : vector<16x1xf32>
      %28 = math.rsqrt %27 : vector<16x1xf32>
      %29 = vector.broadcast %28 : vector<16x1xf32> to vector<16x128xf32>
      %30 = arith.mulf %15, %29 : vector<16x128xf32>
      %c0_22 = arith.constant 0 : index
      %c0_23 = arith.constant 0 : index
      %31 = vector.load %arg5[%c0_22, %c0_23] : memref<8x128xf32, #tpu.memory_space<vmem>>, vector<8x128xf32>
      %cst_24 = arith.constant dense<0.000000e+00> : vector<16x8xf32>
      %32 = tpu.matmul %30, %31, %cst_24 {dimension_numbers = #tpu.dot_dimension_numbers<[1], [1], [0], [0], [0, 0, 1, 0], [], []>} : vector<16x128xf32>, vector<8x128xf32>, vector<16x8xf32> -> vector<16x8xf32>
      %cst_25 = arith.constant dense<0.000000e+00> : vector<16xf32>
      %33 = vector.multi_reduction <add>, %32, %cst_25 [1] : vector<16x8xf32> to vector<16xf32>
      %34 = vector.shape_cast %33 : vector<16xf32> to vector<16x1xf32>
      %35 = vector.shape_cast %34 : vector<16x1xf32> to vector<16x1xf32>
      %36 = vector.broadcast %35 : vector<16x1xf32> to vector<16x128xf32>
      %c0_26 = arith.constant 0 : index
      %c0_27 = arith.constant 0 : index
      %37 = vector.load %arg9[%c0_26, %c0_27] : memref<16x128xf32, #tpu.memory_space<vmem>>, vector<16x128xf32>
      tpu.vector_store %arg9[%c0_26, %c0_27], %36 {strides = array<i32>} : memref<16x128xf32, #tpu.memory_space<vmem>>, vector<16x128xf32>,
    } else {
    }
    return
  }
  func.func @transform_0(%arg0: i32, %arg1: i32) -> (i32, i32) {
    %c0_i32 = arith.constant 0 : i32
    return %arg0, %arg1 : i32, i32
  }
  func.func @transform_1(%arg0: i32, %arg1: i32) -> (i32, i32) {
    %c0_i32 = arith.constant 0 : i32
    %c0_i32_0 = arith.constant 0 : i32
    return %arg1, %c0_i32 : i32, i32
  }
  func.func @transform_2(%arg0: i32, %arg1: i32) -> (i32, i32) {
    %c0_i32 = arith.constant 0 : i32
    %c0_i32_0 = arith.constant 0 : i32
    %c0_i32_1 = arith.constant 0 : i32
    return %c0_i32, %c0_i32_0 : i32, i32
  }
  func.func @transform_3(%arg0: i32, %arg1: i32) -> (i32, i32) {
    %c0_i32 = arith.constant 0 : i32
    %c0_i32_0 = arith.constant 0 : i32
    %c0_i32_1 = arith.constant 0 : i32
    return %c0_i32, %c0_i32_0 : i32, i32
  }
  func.func @transform_4(%arg0: i32, %arg1: i32) -> (i32, i32) {
    %c0_i32 = arith.constant 0 : i32
    %c0_i32_0 = arith.constant 0 : i32
    %c0_i32_1 = arith.constant 0 : i32
    return %c0_i32, %c0_i32_0 : i32, i32
  }
  func.func @transform_5(%arg0: i32, %arg1: i32) -> (i32, i32) {
    %c0_i32 = arith.constant 0 : i32
    %c0_i32_0 = arith.constant 0 : i32
    %c0_i32_1 = arith.constant 0 : i32
    return %c0_i32, %c0_i32_0 : i32, i32
  }
  func.func @transform_6(%arg0: i32, %arg1: i32) -> (i32, i32) {
    %c0_i32 = arith.constant 0 : i32
    %c0_i32_0 = arith.constant 0 : i32
    return %arg0, %c0_i32 : i32, i32
  }
  func.func @transform_7(%arg0: i32, %arg1: i32) -> (i32, i32) {
    %c0_i32 = arith.constant 0 : i32
    %c0_i32_0 = arith.constant 0 : i32
    return %arg0, %c0_i32 : i32, i32
  }
}

</mosaic_0001>

<bundles_post_ra>
// kernel: model_forward.1
= control target key start
LH: loop header
LB: loop body
LE: loop exit
PB: predicated region body
PF: predicated region fallthrough
CT: control target
= control target key end

     0   :  { %s1399_s24 = smov 0   ;;  %s1401_s25 = smov 0   ;;  %s1551_s0 = inlined_call_operand.vmem [shape: bf16[16,1024], index: 0, kind: input, shape index: {}]   ;;  %s1552_s1 = inlined_call_operand.vmem [shape: bf16[1024,128], index: 1, kind: input, shape index: {}]   ;;  %s1553_s2 = inlined_call_operand.vmem [shape: f32[1,128], index: 2, kind: input, shape index: {}]   ;;  %s1554_s3 = inlined_call_operand.vmem [shape: f32[8,128], index: 3, kind: input, shape index: {}]   ;;  %s1555_s4 = inlined_call_operand.vmem [shape: bf16[128,128], index: 4, kind: input, shape index: {}]   ;;  %s1556_s5 = inlined_call_operand.vmem [shape: f32[1,128], index: 5, kind: input, shape index: {}]   ;;  %s1557_s6 = inlined_call_operand.vmem [shape: f32[16,128], index: 6, kind: output, shape index: {0}]   ;;  %s1558_s7 = inlined_call_operand.vmem [shape: f32[16,128], index: 7, kind: output, shape index: {1}]  }
   0x1   :  { %s1403_s26 = smov 0   ;;  %s1405_s27 = smov 0  }
   0x2   :  { %s1407_s28 = smov 0  }
   0x3 LB: > { %s27_s29 = sadd.s32 1, %s1350_s27  ;;  %p46_p1 = scmp.ne.s32.totalorder %s1342_s25, %s1338_s24  ;;  %s1354_s28 = sphi %s1407_s28, %s18_s28   ;;  %s1350_s27 = sphi %s1405_s27, %s1562_s27   ;;  %s1346_s26 = sphi %s1403_s26, %s1561_s26   ;;  %s1342_s25 = sphi %s1401_s25, %s1560_s25   ;;  %s1338_s24 = sphi %s1399_s24, %s1559_s24  }
   0x4   : > { %p28_p0 = scmp.ge.s32.totalorder %s27_s29, 2  ;;  %p47_p2 = scmp.eq.s32.totalorder %s1354_s28, 0 }
   0x5   : > { %s39_s8 = sadd.s32 1, %s1342_s25  ;;  %p1079_p5 = scmp.ge.s32.totalorder %s1354_s28, 2 }
   0x6   : > { %s1564_s29 = smov (%p28_p0, %s27_s29), 0  ;;  %p48_p3 = por %p47_p2, %p46_p1 }
   0x7   : > { %s35_s30 = ssub.s32 %s1350_s27, %s1564_s29  ;;  %246 = sbr.rel (%p1079_p5) target bundleno = 21 (0x15), region = 32 }
   0x8   : > { %p37_p4 = scmp.eq.s32.totalorder %s35_s30, 0 }
   0xa   : > { %s1434_s9 = scalar_select %p37_p4, %s1342_s25, %s39_s8  }
   0xe   : > { %249 = sbr.rel (!%p48_p3) target bundleno = 21 (0x15), region = 36  ;;  %s251_s10 = sand.u32 (%p48_p3), 1, %s1342_s25  }
   0xf   : > { %s1141_s11 = sshll.u32 (%p48_p3), %s1350_s27, 4  ;;  %s1080_s12 = sshll.u32 (%p48_p3), %s251_s10, 5 }
  0x10   : > { %s259_s15 = scalar_lea.vmem (%p48_p3), %s1551_s0, %s1141_s11  ;;  %s253_s16 = scalar_lea.vmem (%p48_p3), [#allocation3], %s1080_s12 }
  0x11   : > { %v272_v0 = vld [vmem:[%s259_s15] sm:$0xff] (%p48_p3)  ;;  %v274_v1 = vld [vmem:[%s259_s15 + $0x8] sm:$0xff] (%p48_p3) }
  0x12   : > { %v276_v2 = vld [vmem:[%s259_s15 + $0x20] sm:$0xff] (%p48_p3)  ;;  %273 = vst [vmem:[%s253_s16] sm:$0xff] (%p48_p3), %v272_v0  ;;  %275 = vst [vmem:[%s253_s16 + $0x8] sm:$0xff] (%p48_p3), %v274_v1  ;;  %v278_v3 = vld [vmem:[%s259_s15 + $0x28] sm:$0xff] (%p48_p3) }
  0x13   : > { %277 = vst [vmem:[%s253_s16 + $0x10] sm:$0xff] (%p48_p3), %v276_v2  ;;  %279 = vst [vmem:[%s253_s16 + $0x18] sm:$0xff] (%p48_p3), %v278_v3 }
  0x15 PF: > { %p1083_p6 = scmp.ge.s32.totalorder %s1354_s28, 1  ;;  %p293_p7 = scmp.lt.s32.totalorder %s1354_s28, 3 }
  0x17   : > { %p294_p8 = pnand %p1083_p6, %p293_p7 }
  0x18   : > { %s300_s17 = sand.u32 (!%p294_p8), 1, %s1338_s24   ;;  %s1085_s18 = sshll.u32 (!%p294_p8), %s1346_s26, 6 }
  0x19   : > { %297 = sbr.rel (%p294_p8) target bundleno = 827 (0x33b), region = 63  ;;  %s1084_s19 = sshll.u32 (!%p294_p8), %s300_s17, 5 }
  0x1a   : > { %p344_p9 = scmp.lt.s32.totalorder (!%p294_p8), %s1085_s18, 127  ;;  %s1451_s30 = scalar_lea.vmem (!%p294_p8), [#allocation3], %s1084_s19 }
  0x1b   : > { %p1087_p10 = scmp.ne.s32.totalorder (!%p294_p8), %s1346_s26, 0 }
  0x20   : > { %s1566_s18 = smov (!%p344_p9, %s1085_s18), 127  ;;  %365 = sbr.rel (%p1087_p10) target bundleno = 39 (0x27), region = 71 }
  0x21   : > { %s1086_s20 = sshll.u32 %s1566_s18, 2  ;;  %v1356_v4 = vmov (!%p1087_p10), 0.0  }
  0x22   : > { %s1449_s23 = scalar_lea.vmem %s1552_s1, %s1086_s20  ;;  %366 = vst [vmem:[#allocation2] sm:$0xff] (!%p1087_p10), %v1356_v4  ;;  %367 = vst [vmem:[#allocation2 + $0x8] sm:$0xff] (!%p1087_p10), %v1356_v4 }
  0x27 PF: > { %v1266_v5 = vld [vmem:[%s1449_s23 + $0x40] sm:$0xff]   ;;  %v1270_v9 = vld [vmem:[%s1449_s23 + $0x48] sm:$0xff]   ;;  %v1274_v13 = vld [vmem:[%s1449_s23 + $0x50] sm:$0xff]   ;;  %p1124_p11 = scmp.ne.s32.totalorder %s1346_s26, 1 }
  0x28   : > { %v1267_v6 = vld [vmem:[%s1449_s23 + $0xc0] sm:$0xff]   ;;  %1142 = vmatprep.subr.bf16.mxu0 %v1266_v5  ;;  %v1271_v10 = vld [vmem:[%s1449_s23 + $0xc8] sm:$0xff]   ;;  %v1275_v14 = vld [vmem:[%s1449_s23 + $0xd0] sm:$0xff]   ;;  %v1357_v4 = vmov (!%p1124_p11), 0.0   ;;  %vm1358_vm0 = vmmov (!%p1124_p11), 0   ;;  %vm954_vm1 = vcmask (!%p1124_p11), 64512  }
  0x29   : > { %v1268_v7 = vld [vmem:[%s1449_s23] sm:$0xff]   ;;  %1164 = vmatprep.subr.bf16.mxu1 %v1267_v6  ;;  %v1272_v11 = vld [vmem:[%s1449_s23 + $0x8] sm:$0xff]   ;;  %v1276_v15 = vld [vmem:[%s1449_s23 + $0x10] sm:$0xff]  }
  0x2a   : > { %v1269_v8 = vld [vmem:[%s1449_s23 + $0x80] sm:$0xff]   ;;  %1143 = vmatpush3.bf16.msra.mxu0 %v1268_v7  ;;  %v1273_v12 = vld [vmem:[%s1449_s23 + $0x88] sm:$0xff]   ;;  %v1277_v16 = vld [vmem:[%s1449_s23 + $0x90] sm:$0xff]  }
  0x2b   : > { %1165 = vmatpush3.bf16.msra.mxu1 %v1269_v8  ;;  %1144 = vmatprep.subr.bf16.mxu0 %v1270_v9  ;;  %v1278_v17 = vld [vmem:[%s1449_s23 + $0x58] sm:$0xff]   ;;  %v1282_v21 = vld [vmem:[%s1449_s23 + $0x60] sm:$0xff]   ;;  %v1286_v25 = vld [vmem:[%s1449_s23 + $0x68] sm:$0xff]  }
  0x2c   : > { %1166 = vmatprep.subr.bf16.mxu1 %v1271_v10  ;;  %v1279_v18 = vld [vmem:[%s1449_s23 + $0xd8] sm:$0xff]   ;;  %v1283_v22 = vld [vmem:[%s1449_s23 + $0xe0] sm:$0xff]   ;;  %v1287_v26 = vld [vmem:[%s1449_s23 + $0xe8] sm:$0xff]  }
  0x2d   : > { %v1280_v19 = vld [vmem:[%s1449_s23 + $0x18] sm:$0xff]   ;;  %v1284_v23 = vld [vmem:[%s1449_s23 + $0x20] sm:$0xff]   ;;  %v1288_v27 = vld [vmem:[%s1449_s23 + $0x28] sm:$0xff]  }
  0x2e   : > { %1145 = vmatpush3.bf16.msra.mxu0 %v1272_v11  ;;  %v1281_v20 = vld [vmem:[%s1449_s23 + $0x98] sm:$0xff]   ;;  %v1285_v24 = vld [vmem:[%s1449_s23 + $0xa0] sm:$0xff]   ;;  %v1289_v28 = vld [vmem:[%s1449_s23 + $0xa8] sm:$0xff]  }
  0x2f   : > { %1167 = vmatpush3.bf16.msra.mxu1 %v1273_v12  ;;  %1146 = vmatprep.subr.bf16.mxu0 %v1274_v13  ;;  %v1290_v29 = vld [vmem:[%s1449_s23 + $0x70] sm:$0xff]   ;;  %v1294_v33 = vld [vmem:[%s1449_s23 + $0x78] sm:$0xff]   ;;  %v368_v50 = vld [vmem:[#allocation2] sm:$0xff] }
  0x30   : > { %1168 = vmatprep.subr.bf16.mxu1 %v1275_v14  ;;  %v1291_v30 = vld [vmem:[%s1449_s23 + $0xf0] sm:$0xff]   ;;  %v1295_v34 = vld [vmem:[%s1449_s23 + $0xf8] sm:$0xff]   ;;  %v369_v55 = vld [vmem:[#allocation2 + $0x8] sm:$0xff] }
  0x31   : > { %v1292_v31 = vld [vmem:[%s1449_s23 + $0x30] sm:$0xff]   ;;  %v1296_v35 = vld [vmem:[%s1449_s23 + $0x38] sm:$0xff]   ;;  %v1125_v60 = vld [vmem:[%s1553_s2] ss:$0 sm:$0xff] (!%p1124_p11) }
  0x32   : > { %1147 = vmatpush3.bf16.msra.mxu0 %v1276_v15  ;;  %v1293_v32 = vld [vmem:[%s1449_s23 + $0xb0] sm:$0xff]   ;;  %v1297_v36 = vld [vmem:[%s1449_s23 + $0xb8] sm:$0xff]   ;;  %v878_v2 = vld [vmem:[%s1554_s3] sm:$0xff] (!%p1124_p11) }
  0x33   : > { %1169 = vmatpush3.bf16.msra.mxu1 %v1277_v16  ;;  %1148 = vmatprep.subr.bf16.mxu0 %v1278_v17  ;;  %v1298_v37 = vld [vmem:[%s1451_s30] ss:$16 sps:$4 sm:$0xff]   ;;  %v1300_v38 = vld [vmem:[%s1451_s30 + $0x4] ss:$16 sps:$4 sm:$0xff]   ;;  %v1301_v39 = vld [vmem:[%s1451_s30 + $0x8] ss:$16 sps:$4 sm:$0xff]  }
  0x34   : > { %1170 = vmatprep.subr.bf16.mxu1 %v1279_v18  ;;  %v1303_v40 = vld [vmem:[%s1451_s30 + $0xc] ss:$16 sps:$4 sm:$0xff]   ;;  %682 = vmatprep.mubr.bf16.mxu0 %v1300_v38  ;;  %v1304_v3 = vld [vmem:[%s1555_s4] sm:$0xff] (!%p1124_p11)   ;;  %v1306_v6 = vld [vmem:[%s1555_s4 + $0x10] sm:$0xff] (!%p1124_p11)  }
  0x35   : > { %723 = vmatprep.mubr.bf16.mxu1 %v1303_v40  ;;  %v1305_v5 = vld [vmem:[%s1555_s4 + $0x8] sm:$0xff] (!%p1124_p11)   ;;  %v1307_v7 = vld [vmem:[%s1555_s4 + $0x18] sm:$0xff] (!%p1124_p11)   ;;  %v1308_v8 = vld [vmem:[%s1555_s4 + $0x20] sm:$0xff] (!%p1124_p11)  }
  0x36   : > { %1149 = vmatpush3.bf16.msra.mxu0 %v1280_v19  ;;  %v1309_v9 = vld [vmem:[%s1555_s4 + $0x28] sm:$0xff] (!%p1124_p11)   ;;  %v1310_v10 = vld [vmem:[%s1555_s4 + $0x30] sm:$0xff] (!%p1124_p11)   ;;  %v1311_v11 = vld [vmem:[%s1555_s4 + $0x38] sm:$0xff] (!%p1124_p11)  }
  0x37   : > { %1171 = vmatpush3.bf16.msra.mxu1 %v1281_v20  ;;  %1150 = vmatprep.subr.bf16.mxu0 %v1282_v21  ;;  %v1126_v21 = vld [vmem:[%s1556_s5] ss:$0 sm:$0xff] (!%p1124_p11) }
  0x38   : > { %1172 = vmatprep.subr.bf16.mxu1 %v1283_v22 }
  0x3a   : > { %1151 = vmatpush3.bf16.msra.mxu0 %v1284_v23 }
  0x3b   : > { %1173 = vmatpush3.bf16.msra.mxu1 %v1285_v24  ;;  %1152 = vmatprep.subr.bf16.mxu0 %v1286_v25 }
  0x3c   : > { %1174 = vmatprep.subr.bf16.mxu1 %v1287_v26 }
  0x3e   : > { %1153 = vmatpush3.bf16.msra.mxu0 %v1288_v27 }
  0x3f   : > { %1175 = vmatpush3.bf16.msra.mxu1 %v1289_v28  ;;  %1154 = vmatprep.subr.bf16.mxu0 %v1290_v29 }
  0x40   : > { %1176 = vmatprep.subr.bf16.mxu1 %v1291_v30 }
  0x42   : > { %1155 = vmatpush3.bf16.msra.mxu0 %v1292_v31 }
  0x43   : > { %1177 = vmatpush3.bf16.msra.mxu1 %v1293_v32  ;;  %1156 = vmatprep.subr.bf16.mxu0 %v1294_v33 }
  0x44   : > { %1178 = vmatprep.subr.bf16.mxu1 %v1295_v34 }
  0x46   : > { %1157 = vmatpush3.bf16.msra.mxu0 %v1296_v35 }
  0x47   : > { %1179 = vmatpush3.bf16.msra.mxu1 %v1297_v36  ;;  %1198 = vmatprep.subr.bf16.mxu0 (!%p1124_p11), %v1357_v4 }
  0x48   : > { %1218 = vmatprep.subr.mxu1 (!%p1124_p11), %v878_v2 }
  0x49   : > { %683 = vmatmul.mubr.bf16.vlgmr.msra.gmra.mrb[0].mxu0 %v1298_v37 }
  0x4a   : > { %724 = vmatmul.mubr.bf16.vlgmr.msra.gmra.mrb[0].mxu1 %v1301_v39  ;;  %1214 = vmatprep.mubr.msk.bf16.mxu0 (!%p1124_p11), %vm1358_vm0, %v1357_v4 }
  0x4b   : > { %1199 = vmatpush3.bf16.msra.mxu0 (!%p1124_p11), %v1304_v3 }
  0x4c   : > { %1200 = vmatprep.subr.bf16.mxu0 (!%p1124_p11), %v1357_v4 }
  0x4f   : > { %1201 = vmatpush3.bf16.msra.mxu0 (!%p1124_p11), %v1305_v5 }
  0x50   : > { %1219 = vmatpush3.xpose.msra.mxu1 (!%p1124_p11), %v878_v2  ;;  %1202 = vmatprep.subr.bf16.mxu0 (!%p1124_p11), %v1357_v4 }
  0x53   : > { %1203 = vmatpush3.bf16.msra.mxu0 (!%p1124_p11), %v1306_v6 }
  0x54   : > { %1204 = vmatprep.subr.bf16.mxu0 (!%p1124_p11), %v1357_v4 }
  0x57   : > { %1205 = vmatpush3.bf16.msra.mxu0 (!%p1124_p11), %v1307_v7 }
  0x58   : > { %1206 = vmatprep.subr.bf16.mxu0 (!%p1124_p11), %v1357_v4 }
  0x5b   : > { %1207 = vmatpush3.bf16.msra.mxu0 (!%p1124_p11), %v1308_v8 }
  0x5c   : > { %1208 = vmatprep.subr.bf16.mxu0 (!%p1124_p11), %v1357_v4 }
  0x5f   : > { %1209 = vmatpush3.bf16.msra.mxu0 (!%p1124_p11), %v1309_v9 }
  0x60   : > { %1210 = vmatprep.subr.bf16.mxu0 (!%p1124_p11), %v1357_v4 }
  0x63   : > { %1211 = vmatpush3.bf16.msra.mxu0 (!%p1124_p11), %v1310_v10 }
  0x64   : > { %1212 = vmatprep.subr.bf16.mxu0 (!%p1124_p11), %v1357_v4 }
  0x67   : > { %1213 = vmatpush3.bf16.msra.mxu0 (!%p1124_p11), %v1311_v11 }
 0x11c   : > { %v1158_v41 = vpop.f32.mrb[0].mxu0 }
 0x11d   : > { %v1180_v42 = vpop.f32.mrb[0].mxu1  ;;  %v1159_v43 = vpop.f32.mrb[1].mxu0 }
 0x11e   : > { %v1160_v44 = vadd.f32 %v1159_v43, %v1158_v41  ;;  %v1181_v45 = vpop.f32.mrb[1].mxu1  ;;  %v1161_v46 = vpop.f32.mrb[2].mxu0 }
 0x11f   : > { %v1182_v47 = vadd.f32 %v1181_v45, %v1180_v42  ;;  %v1183_v48 = vpop.f32.mrb[2].mxu1  ;;  %v1162_v49 = vpop.f32.mrb[3].mxu0 }
 0x120   : > { %v1163_v51 = vadd.f32 %v1162_v49, %v1161_v46  ;;  %v1184_v52 = vpop.f32.mrb[3].mxu1 }
 0x121   : > { %v726_v53 = vadd.f32 %v1182_v47, %v1160_v44  ;;  %v1185_v54 = vadd.f32 %v1184_v52, %v1183_v48  ;;  %739 = sbr.rel (%p1124_p11) target bundleno = 827 (0x33b), region = 75 }
 0x123   : > { %v732_v56 = vadd.f32 %v726_v53, %v368_v50  ;;  %v729_v57 = vadd.f32 %v1185_v54, %v1163_v51 }
 0x125   : > { %734 = vst [vmem:[#allocation2] sm:$0xff] %v732_v56  ;;  %v733_v58 = vadd.f32 %v729_v57, %v369_v55 }
 0x127   : > { %735 = vst [vmem:[#allocation2 + $0x8] sm:$0xff] %v733_v58 }
 0x12c   : > { %v740_v59 = vld [vmem:[#allocation2] sm:$0xff] }
 0x12d   : > { %v749_v62 = vadd.f32 %v1125_v60, %v740_v59 }
 0x12e   : > { %v741_v61 = vld [vmem:[#allocation2 + $0x8] sm:$0xff] }
 0x12f   : > { %v750_v63 = vadd.f32 %v1125_v60, %v741_v61  ;;  %v866_v0 = vmul.f32 %v749_v62, %v749_v62 }
 0x131   : > { %868 = vadd.xlane.f32.xlu0 %v866_v0  ;;  %v867_v1 = vmul.f32 %v750_v63, %v750_v63  ;;  %v751_v12 = vpack.c.bf16 %v750_v63, %v749_v62 }
 0x133   : > { %1215 = vmatmul.mubr.bf16.vlgmr.msra.gmra.mrb[0].mxu0 %v751_v12 }
 0x135   : > { %870 = vadd.xlane.f32.xlu0 %v867_v1 }
 0x1be   : > { %v869_v13 = vpop.xlane.xlu0 %868 }
 0x1bf   : > { %v872_v14 = vadd.f32 1e-12, %v869_v13 }
 0x1c1   : > { %1312 = vrsqrt.f32 %v872_v14 }
 0x1c2   : > { %v871_v15 = vpop.xlane.xlu0 %870 }
 0x1c3   : > { %v873_v16 = vadd.f32 1e-12, %v871_v15 }
 0x1c5   : > { %1314 = vrsqrt.f32 %v873_v16 }
 0x1cb   : > { %v1313_v17 = vpop.eup %1312 }
 0x1cc   : > { %v876_v18 = vmul.f32 %v1313_v17, %v749_v62 }
 0x1ce   : > { %1220 = vmatprep.mubr.f32.mxu1 %v876_v18 }
 0x1cf   : > { %v1315_v19 = vpop.eup %1314 }
 0x1d0   : > { %v877_v20 = vmul.f32 %v1315_v19, %v750_v63 }
 0x1d2   : > { %1221 = vmatmul.mubr.f32.vlgmr.msra.gmra.mrb[0].mxu1 %v877_v20 }
 0x206   : > { %v857_v22 = vpop.f32.mrb[0].mxu0 }
 0x207   : > { %v858_v23 = vadd.f32 %v1126_v21, %v857_v22  ;;  %v1216_v24 = vpop.f32.mrb[1].mxu0 }
 0x208   : > { %v860_v25 = vpop.f32.mrb[2].mxu0 }
 0x209   : > { %864 = vst [vmem:[%s1557_s6] sm:$0xff] %v858_v23  ;;  %v861_v26 = vadd.f32 %v1126_v21, %v860_v25  ;;  %v1217_v27 = vpop.f32.mrb[3].mxu0 }
 0x20b   : > { %865 = vst [vmem:[%s1557_s6 + $0x8] sm:$0xff] %v861_v26 }
 0x2a5   : > { %v1222_v28 = vpop.f32.mrb[0].mxu1 }
 0x2a6   : > { %v945_v29 = vpop.f32.mrb[1].mxu1  ;;  %v958_v31 = vsel %vm954_vm1, %v1222_v28, 0.0 }
 0x2a7   : > { %v955_v30 = vsel %vm954_vm1, %v945_v29, 0.0 }
 0x2a8   : > { %956 = vadd.xlane.f32.xlu1 %v955_v30 }
 0x2ac   : > { %959 = vadd.xlane.f32.xlu1 %v958_v31 }
 0x335   : > { %v957_v32 = vpop.xlane.xlu1 %956 }
 0x336   : > { %961 = vst [vmem:[%s1558_s7] sm:$0xff] %v957_v32 }
 0x339   : > { %v960_v33 = vpop.xlane.xlu1 %959 }
 0x33a   : > { %962 = vst [vmem:[%s1558_s7 + $0x8] sm:$0xff] %v960_v33 }
 0x33b PF: > { %s18_s28 = sadd.s32 1, %s1354_s28   ;;  %s1559_s24 = smov %s1342_s25 }
 0x33c   : > { %p15_p12 = scmp.ge.s32.totalorder %s18_s28, 4   ;;  %s1560_s25 = smov %s1434_s9 }
 0x33d   : > { %s1561_s26 = smov %s1350_s27  ;;  %s1562_s27 = smov %s1564_s29 }
 0x33e   :  { %17 = sbr.rel (!%p15_p12) target bundleno = 3 (0x3), region = 125 }

</bundles_post_ra>
